<compile_context>
chip_gen: v5e
topology: v5e:2x2
jax: 0.10.0
libtpu: 0.0.40
codegen_flags: <defaults>
</compile_context>

<pallas_src>
import functools

import jax
import jax.numpy as jnp
from jax import lax
from jax.experimental import pallas as pl
from jax.experimental.pallas import tpu as pltpu


def _dw_residual_kernel(x_ref, w1_ref, b1_ref, w2_ref, b2_ref, w3_ref, b3_ref,
                        o_ref, *, chunk, n_full, rem, unroll):
    """One (Cin, TL) pixel tile, strip-mined into `chunk`-lane sub-tiles.

    Per sub-tile: three chained channel matmuls + bias + ReLU6 + residual,
    with every intermediate living in vregs.
    """
    f32 = jnp.float32
    w1 = w1_ref[...].astype(f32)            # (Cmid, Cin)
    w2 = w2_ref[...].astype(f32)            # (Cmid, Cmid)
    w3 = w3_ref[...].astype(f32)            # (Cin,  Cmid)
    b1 = b1_ref[...].astype(f32)            # (Cmid, 1)
    b2 = b2_ref[...].astype(f32)            # (Cmid, 1)
    b3 = b3_ref[...].astype(f32)            # (Cin,  1)
    cmid = w1.shape[0]
    cin = w3.shape[0]

    def do_block(start, width, b1b, b2b, b3b):
        x = x_ref[:, pl.ds(start, width)].astype(f32)                  # (Cin, width)
        h1 = jnp.clip(jnp.dot(w1, x, preferred_element_type=f32) + b1b, 0.0, 6.0)
        h2 = jnp.clip(jnp.dot(w2, h1, preferred_element_type=f32) + b2b, 0.0, 6.0)
        h3 = jnp.clip(jnp.dot(w3, h2, preferred_element_type=f32) + b3b, 0.0, 6.0)
        o_ref[:, pl.ds(start, width)] = (h3 + x).astype(o_ref.dtype)

    if n_full > 0:
        # Hoist the bias broadcasts out of the loop (not CSE'd if left inside).
        b1b = jnp.broadcast_to(b1, (cmid, chunk))
        b2b = jnp.broadcast_to(b2, (cmid, chunk))
        b3b = jnp.broadcast_to(b3, (cin, chunk))

        def body(c, carry):
            start = pl.multiple_of(c * chunk, chunk)
            do_block(start, chunk, b1b, b2b, b3b)
            return carry

        if unroll:
            lax.fori_loop(0, n_full, body, 0, unroll=True)
        else:
            lax.fori_loop(0, n_full, body, 0)

    if rem > 0:
        # Static tail when the tile is not a multiple of `chunk`.
        start = n_full * chunk
        do_block(start, rem,
                 jnp.broadcast_to(b1, (cmid, rem)),
                 jnp.broadcast_to(b2, (cmid, rem)),
                 jnp.broadcast_to(b3, (cin, rem)))


def _tpu_vmem_bytes():
    """Physical VMEM per core; conservative (v7x-like) fallback if unknown."""
    try:
        return int(pltpu.get_tpu_info().vmem_capacity_bytes)
    except Exception:
        return 64 * 1024 * 1024


def _choose_lane_tile(N, HW, tl_target, chunk):
    """Pick the pixel (lane) tile size."""
    if HW <= tl_target:
        if N == 1 and HW >= 2 * chunk:
            # Guarantee >= 2 parallel grid steps so multi-TensorCore parts
            # (v7x) get work even for single-batch inputs.
            half = -(-HW // 2)
            return min(-(-half // 128) * 128, HW)
        return HW                             # full extent: always legal
    # Large inputs: big lane tile, multiple of `chunk` so the inner loop is exact.
    return max((tl_target // chunk) * chunk, chunk)


def dw_residual_block(x_nchw, params, *, tl_target=None, chunk=512):
    """x_nchw: (N, Cin, H, W) with Cin == in_dim // 2 == out_dim // 2."""
    w1, b1, w2, b2, w3, b3 = params
    N, Cin, H, W = x_nchw.shape
    Cmid = w1.shape[0]                                  # out_dim
    assert w1.shape[1] == Cin, "dwcon1 in-channels mismatch"
    assert w3.shape[0] == Cin, "residual add requires out_dim//2 == in_dim//2"

    HW = H * W
    # NCHW -> (N, Cin, H*W): pure reshape, NO transpose / extra HBM traffic.
    x3d = x_nchw.reshape(N, Cin, HW)

    # Generation-aware tile budget (128 MiB VMEM on v5e/v6e, 64 MiB on v7x).
    big_vmem = _tpu_vmem_bytes() >= 128 * 1024 * 1024
    if tl_target is None:
        tl_target = (256 * 1024) if big_vmem else (128 * 1024)
    vmem_limit = (96 * 1024 * 1024) if big_vmem else (48 * 1024 * 1024)

    tl = _choose_lane_tile(N, HW, tl_target, chunk)
    n_full, rem = divmod(tl, chunk)
    n_pix_tiles = pl.cdiv(HW, tl)                       # partial last tile is masked
    grid = (N, n_pix_tiles)
    unroll = n_full <= 8                                # short loops: full unroll

    # Advisory cost estimate for XLA's scheduler around this mem-bound call.
    itemsize = jnp.dtype(x_nchw.dtype).itemsize
    flops = 2 * Cmid * (2 * Cin + Cmid) * N * HW
    bytes_io = 2 * N * Cin * HW * itemsize              # x in + out
    bytes_w = sum(int(p.size) * jnp.dtype(p.dtype).itemsize
                  for p in (w1, b1, w2, b2, w3, b3))
    cost = pl.CostEstimate(flops=flops, transcendentals=0,
                           bytes_accessed=bytes_io + bytes_w)

    kernel = functools.partial(_dw_residual_kernel, chunk=chunk,
                               n_full=n_full, rem=rem, unroll=unroll)

    out3d = pl.pallas_call(
        kernel,
        out_shape=jax.ShapeDtypeStruct((N, Cin, HW), x_nchw.dtype),
        grid_spec=pltpu.PrefetchScalarGridSpec(
            num_scalar_prefetch=0,
            grid=grid,
            in_specs=[
                # x tile: batch squeezed, channels in sublanes, pixels in lanes.
                pl.BlockSpec((None, Cin, tl), lambda n, p: (n, 0, p)),
                # Weights / biases: resident across the whole grid.
                pl.BlockSpec((Cmid, Cin), lambda n, p: (0, 0)),    # W1
                pl.BlockSpec((Cmid, 1), lambda n, p: (0, 0)),      # b1
                pl.BlockSpec((Cmid, Cmid), lambda n, p: (0, 0)),   # W2
                pl.BlockSpec((Cmid, 1), lambda n, p: (0, 0)),      # b2
                pl.BlockSpec((Cin, Cmid), lambda n, p: (0, 0)),    # W3
                pl.BlockSpec((Cin, 1), lambda n, p: (0, 0)),       # b3
            ],
            out_specs=pl.BlockSpec((None, Cin, tl), lambda n, p: (n, 0, p)),
        ),
        compiler_params=pltpu.CompilerParams(
            dimension_semantics=("parallel", "parallel"),
            vmem_limit_bytes=vmem_limit,
        ),
        cost_estimate=cost,
    )(x3d, w1, b1, w2, b2, w3, b3)

    # (N, Cin, H*W) -> NCHW: again a pure reshape.
    return out3d.reshape(N, Cin, H, W)


def init_params(key, in_dim, out_dim, bias=True, dtype=jnp.float32):
    """Deterministic synthetic parameters matching DwResidualBlock shapes.

    Weights stay in native PyTorch (out, in) orientation -- in channel-first
    compute layout that is exactly the matrix applied to a (C, pixels) tile.
    Biases are (C, 1) so they broadcast over the lane (pixel) axis.
    """
    cin = in_dim // 2
    cout = out_dim // 2
    k1, k2, k3, k4, k5, k6 = jax.random.split(key, 6)
    scale = 0.1
    w1 = (jax.random.normal(k1, (out_dim, cin)) * scale).astype(dtype)      # (Cmid, Cin)
    w2 = (jax.random.normal(k2, (out_dim, out_dim)) * scale).astype(dtype)  # (Cmid, Cmid)
    w3 = (jax.random.normal(k3, (cout, out_dim)) * scale).astype(dtype)     # (Cin,  Cmid)
    if bias:
        b1 = (jax.random.normal(k4, (out_dim, 1)) * scale).astype(dtype)
        b3 = (jax.random.normal(k6, (cout, 1)) * scale).astype(dtype)
    else:
        b1 = jnp.zeros((out_dim, 1), dtype)
        b3 = jnp.zeros((cout, 1), dtype)
    # nn.Linear always has a bias in the reference module.
    b2 = (jax.random.normal(k5, (out_dim, 1)) * scale).astype(dtype)
    return (w1, b1, w2, b2, w3, b3)


def _reference(x_nchw, params):
    """Pure-JAX reference mirroring the PyTorch forward exactly."""
    w1, b1, w2, b2, w3, b3 = params
    x = jnp.transpose(x_nchw, (0, 2, 3, 1)).astype(jnp.float32)    # NHWC
    h1 = jnp.clip(x @ w1.T + b1[:, 0], 0.0, 6.0)
    h2 = jnp.clip(h1 @ w2.T + b2[:, 0], 0.0, 6.0)
    h3 = jnp.clip(h2 @ w3.T + b3[:, 0], 0.0, 6.0)
    out = h3 + x
    return jnp.transpose(out, (0, 3, 1, 2))                        # NCHW


if __name__ == "__main__":
    # Module config: in_dim = out_dim = 8  =>  x has in_dim//2 = 4 channels.
    in_dim, out_dim, bias = 8, 8, True
    key = jax.random.PRNGKey(0)
    kx, kp, kx2, kx3, kx4 = jax.random.split(key, 5)
    params = init_params(kp, in_dim, out_dim, bias=bias)

    # Test 1: canonical tiny shape; tail-only path, grid = (2, 1).
    x = jax.random.normal(kx, (2, in_dim // 2, 16, 16), dtype=jnp.float32)  # NCHW
    out = jax.block_until_ready(dw_residual_block(x, params))
    ref = _reference(x, params)
    assert out.shape == x.shape, (out.shape, x.shape)
    assert jnp.allclose(out, ref, atol=1e-5, rtol=1e-5), "mismatch vs reference (t1)"

    # Test 2: N == 1 -> pixel axis split in two (>= 2 parallel grid steps for
    # v7x) and the chunked inner loop runs (n_full >= 1).
    x2 = jax.random.normal(kx2, (1, in_dim // 2, 32, 32), dtype=jnp.float32)
    out2 = jax.block_until_ready(dw_residual_block(x2, params))
    ref2 = _reference(x2, params)
    assert out2.shape == x2.shape
    assert jnp.allclose(out2, ref2, atol=1e-5, rtol=1e-5), "mismatch vs reference (t2)"

    # Test 3: multi pixel-tile grid with a partial (masked) last tile and a
    # multi-chunk inner loop (forced small tl_target).
    x3 = jax.random.normal(kx3, (1, in_dim // 2, 48, 40), dtype=jnp.float32)
    out3 = jax.block_until_ready(dw_residual_block(x3, params, tl_target=1024))
    ref3 = _reference(x3, params)
    assert out3.shape == x3.shape
    assert jnp.allclose(out3, ref3, atol=1e-5, rtol=1e-5), "mismatch vs reference (t3)"

    # Test 4: bf16 HBM storage for x/out (the big bandwidth lever); compute is f32.
    x4 = jax.random.normal(kx4, (1, in_dim // 2, 64, 64), dtype=jnp.float32)
    out4 = jax.block_until_ready(dw_residual_block(x4.astype(jnp.bfloat16), params))
    ref4 = _reference(x4.astype(jnp.bfloat16).astype(jnp.float32), params)
    assert out4.dtype == jnp.bfloat16
    assert jnp.allclose(out4.astype(jnp.float32), ref4, atol=5e-2, rtol=5e-2), \
        "mismatch vs reference (t4 bf16)"

    print("KERNEL_OK")
</pallas_src>

<mosaic_0001>
module attributes {stable_mosaic.version = 11 : i64} {
  func.func @_dw_residual_kernel(%arg0: i32, %arg1: i32, %arg2: memref<1x4x256xf32, #tpu.memory_space<vmem>>, %arg3: memref<8x4xf32, #tpu.memory_space<vmem>>, %arg4: memref<8x1xf32, #tpu.memory_space<vmem>>, %arg5: memref<8x8xf32, #tpu.memory_space<vmem>>, %arg6: memref<8x1xf32, #tpu.memory_space<vmem>>, %arg7: memref<4x8xf32, #tpu.memory_space<vmem>>, %arg8: memref<4x1xf32, #tpu.memory_space<vmem>>, %arg9: memref<1x4x256xf32, #tpu.memory_space<vmem>>) attributes {dimension_semantics = [#tpu.dimension_semantics<parallel>, #tpu.dimension_semantics<parallel>], iteration_bounds = array<i64: 2, 1>, scalar_prefetch = 0 : i64, scratch_operands = 0 : i64, tpu.core_type = #tpu.core_type<tc>, window_params = [{transform_indices = @transform_0, window_bounds = array<i64: 1, 4, 256>}, {pipeline_mode = #tpu.pipeline_mode<synchronous>, transform_indices = @transform_1, window_bounds = array<i64: 8, 4>}, {pipeline_mode = #tpu.pipeline_mode<synchronous>, transform_indices = @transform_2, window_bounds = array<i64: 8, 1>}, {pipeline_mode = #tpu.pipeline_mode<synchronous>, transform_indices = @transform_3, window_bounds = array<i64: 8, 8>}, {pipeline_mode = #tpu.pipeline_mode<synchronous>, transform_indices = @transform_4, window_bounds = array<i64: 8, 1>}, {pipeline_mode = #tpu.pipeline_mode<synchronous>, transform_indices = @transform_5, window_bounds = array<i64: 4, 8>}, {pipeline_mode = #tpu.pipeline_mode<synchronous>, transform_indices = @transform_6, window_bounds = array<i64: 4, 1>}, {transform_indices = @transform_7, window_bounds = array<i64: 1, 4, 256>}]} {
    %c0 = arith.constant 0 : index
    %c0_0 = arith.constant 0 : index
    %0 = vector.load %arg3[%c0, %c0_0] : memref<8x4xf32, #tpu.memory_space<vmem>>, vector<8x4xf32>
    %c0_1 = arith.constant 0 : index
    %c0_2 = arith.constant 0 : index
    %1 = vector.load %arg5[%c0_1, %c0_2] : memref<8x8xf32, #tpu.memory_space<vmem>>, vector<8x8xf32>
    %c0_3 = arith.constant 0 : index
    %c0_4 = arith.constant 0 : index
    %2 = vector.load %arg7[%c0_3, %c0_4] : memref<4x8xf32, #tpu.memory_space<vmem>>, vector<4x8xf32>
    %c0_5 = arith.constant 0 : index
    %c0_6 = arith.constant 0 : index
    %3 = vector.load %arg4[%c0_5, %c0_6] : memref<8x1xf32, #tpu.memory_space<vmem>>, vector<8x1xf32>
    %c0_7 = arith.constant 0 : index
    %c0_8 = arith.constant 0 : index
    %4 = vector.load %arg6[%c0_7, %c0_8] : memref<8x1xf32, #tpu.memory_space<vmem>>, vector<8x1xf32>
    %c0_9 = arith.constant 0 : index
    %c0_10 = arith.constant 0 : index
    %5 = vector.load %arg8[%c0_9, %c0_10] : memref<4x1xf32, #tpu.memory_space<vmem>>, vector<4x1xf32>
    %6 = vector.shape_cast %3 : vector<8x1xf32> to vector<8x1xf32>
    %7 = vector.broadcast %6 : vector<8x1xf32> to vector<8x256xf32>
    %8 = vector.shape_cast %4 : vector<8x1xf32> to vector<8x1xf32>
    %9 = vector.broadcast %8 : vector<8x1xf32> to vector<8x256xf32>
    %10 = vector.shape_cast %5 : vector<4x1xf32> to vector<4x1xf32>
    %11 = vector.broadcast %10 : vector<4x1xf32> to vector<4x256xf32>
    %c0_11 = arith.constant 0 : index
    %c0_12 = arith.constant 0 : index
    %c0_13 = arith.constant 0 : index
    %12 = vector.load %arg2[%c0_11, %c0_12, %c0_13] : memref<1x4x256xf32, #tpu.memory_space<vmem>>, vector<1x4x256xf32>
    %13 = vector.shape_cast %12 : vector<1x4x256xf32> to vector<4x256xf32>
    %cst = arith.constant dense<0.000000e+00> : vector<8x256xf32>
    %14 = tpu.matmul %0, %13, %cst {dimension_numbers = #tpu.dot_dimension_numbers<[1], [0], [0], [1], [0, 0, 1, 1], [], []>} : vector<8x4xf32>, vector<4x256xf32>, vector<8x256xf32> -> vector<8x256xf32>
    %15 = arith.addf %14, %7 : vector<8x256xf32>
    %cst_14 = arith.constant 0.000000e+00 : f32
    %cst_15 = arith.constant 6.000000e+00 : f32
    %16 = vector.broadcast %cst_14 : f32 to vector<8x256xf32>
    %17 = arith.maximumf %16, %15 : vector<8x256xf32>
    %18 = vector.broadcast %cst_15 : f32 to vector<8x256xf32>
    %19 = arith.minimumf %18, %17 : vector<8x256xf32>
    %cst_16 = arith.constant dense<0.000000e+00> : vector<8x256xf32>
    %20 = tpu.matmul %1, %19, %cst_16 {dimension_numbers = #tpu.dot_dimension_numbers<[1], [0], [0], [1], [0, 0, 1, 1], [], []>} : vector<8x8xf32>, vector<8x256xf32>, vector<8x256xf32> -> vector<8x256xf32>
    %21 = arith.addf %20, %9 : vector<8x256xf32>
    %cst_17 = arith.constant 0.000000e+00 : f32
    %cst_18 = arith.constant 6.000000e+00 : f32
    %22 = vector.broadcast %cst_17 : f32 to vector<8x256xf32>
    %23 = arith.maximumf %22, %21 : vector<8x256xf32>
    %24 = vector.broadcast %cst_18 : f32 to vector<8x256xf32>
    %25 = arith.minimumf %24, %23 : vector<8x256xf32>
    %cst_19 = arith.constant dense<0.000000e+00> : vector<4x256xf32>
    %26 = tpu.matmul %2, %25, %cst_19 {dimension_numbers = #tpu.dot_dimension_numbers<[1], [0], [0], [1], [0, 0, 1, 1], [], []>} : vector<4x8xf32>, vector<8x256xf32>, vector<4x256xf32> -> vector<4x256xf32>
    %27 = arith.addf %26, %11 : vector<4x256xf32>
    %cst_20 = arith.constant 0.000000e+00 : f32
    %cst_21 = arith.constant 6.000000e+00 : f32
    %28 = vector.broadcast %cst_20 : f32 to vector<4x256xf32>
    %29 = arith.maximumf %28, %27 : vector<4x256xf32>
    %30 = vector.broadcast %cst_21 : f32 to vector<4x256xf32>
    %31 = arith.minimumf %30, %29 : vector<4x256xf32>
    %32 = arith.addf %31, %13 : vector<4x256xf32>
    %c0_22 = arith.constant 0 : index
    %c0_23 = arith.constant 0 : index
    %c0_24 = arith.constant 0 : index
    %33 = vector.load %arg9[%c0_22, %c0_23, %c0_24] : memref<1x4x256xf32, #tpu.memory_space<vmem>>, vector<1x4x256xf32>
    %34 = vector.shape_cast %33 : vector<1x4x256xf32> to vector<4x256xf32>
    %35 = vector.shape_cast %32 : vector<4x256xf32> to vector<1x4x256xf32>
    tpu.vector_store %arg9[%c0_22, %c0_23, %c0_24], %35 {strides = array<i32>} : memref<1x4x256xf32, #tpu.memory_space<vmem>>, vector<1x4x256xf32>,
    return
  }
  func.func @transform_0(%arg0: i32, %arg1: i32) -> (i32, i32, i32) {
    %c0_i32 = arith.constant 0 : i32
    %c0_i32_0 = arith.constant 0 : i32
    return %arg0, %c0_i32, %arg1 : i32, i32, i32
  }
  func.func @transform_1(%arg0: i32, %arg1: i32) -> (i32, i32) {
    %c0_i32 = arith.constant 0 : i32
    %c0_i32_0 = arith.constant 0 : i32
    %c0_i32_1 = arith.constant 0 : i32
    return %c0_i32, %c0_i32_0 : i32, i32
  }
  func.func @transform_2(%arg0: i32, %arg1: i32) -> (i32, i32) {
    %c0_i32 = arith.constant 0 : i32
    %c0_i32_0 = arith.constant 0 : i32
    %c0_i32_1 = arith.constant 0 : i32
    return %c0_i32, %c0_i32_0 : i32, i32
  }
  func.func @transform_3(%arg0: i32, %arg1: i32) -> (i32, i32) {
    %c0_i32 = arith.constant 0 : i32
    %c0_i32_0 = arith.constant 0 : i32
    %c0_i32_1 = arith.constant 0 : i32
    return %c0_i32, %c0_i32_0 : i32, i32
  }
  func.func @transform_4(%arg0: i32, %arg1: i32) -> (i32, i32) {
    %c0_i32 = arith.constant 0 : i32
    %c0_i32_0 = arith.constant 0 : i32
    %c0_i32_1 = arith.constant 0 : i32
    return %c0_i32, %c0_i32_0 : i32, i32
  }
  func.func @transform_5(%arg0: i32, %arg1: i32) -> (i32, i32) {
    %c0_i32 = arith.constant 0 : i32
    %c0_i32_0 = arith.constant 0 : i32
    %c0_i32_1 = arith.constant 0 : i32
    return %c0_i32, %c0_i32_0 : i32, i32
  }
  func.func @transform_6(%arg0: i32, %arg1: i32) -> (i32, i32) {
    %c0_i32 = arith.constant 0 : i32
    %c0_i32_0 = arith.constant 0 : i32
    %c0_i32_1 = arith.constant 0 : i32
    return %c0_i32, %c0_i32_0 : i32, i32
  }
  func.func @transform_7(%arg0: i32, %arg1: i32) -> (i32, i32, i32) {
    %c0_i32 = arith.constant 0 : i32
    %c0_i32_0 = arith.constant 0 : i32
    return %arg0, %c0_i32, %arg1 : i32, i32, i32
  }
}

</mosaic_0001>

<bundles_post_ra>
// kernel: tpu_custom_call.1
= control target key start
LH: loop header
LB: loop body
LE: loop exit
PB: predicated region body
PF: predicated region fallthrough
CT: control target
= control target key end

     0   :  { %12 = vsyncpa [#allocation3], 0  ;;  %s914_s0 = inlined_call_operand.vmem [shape: f32[2,4,256], index: 0, kind: input, shape index: {}]   ;;  %s915_s1 = inlined_call_operand.vmem [shape: f32[8,4], index: 1, kind: input, shape index: {}]   ;;  %s916_s2 = inlined_call_operand.vmem [shape: f32[8,1], index: 2, kind: input, shape index: {}]   ;;  %s917_s3 = inlined_call_operand.vmem [shape: f32[8,8], index: 3, kind: input, shape index: {}]   ;;  %s918_s4 = inlined_call_operand.vmem [shape: f32[8,1], index: 4, kind: input, shape index: {}]   ;;  %s919_s5 = inlined_call_operand.vmem [shape: f32[4,8], index: 5, kind: input, shape index: {}]   ;;  %s920_s6 = inlined_call_operand.vmem [shape: f32[4,1], index: 6, kind: input, shape index: {}]   ;;  %s921_s7 = inlined_call_operand.hbm [shape: f32[2,4,256], index: 7, kind: output, shape index: {}]  }
   0x1   :  { %14 = vsyncpa [#allocation3 + $0x1], 0  ;;  %s792_s24 = smov 0   ;;  %s794_s25 = smov 0  }
   0x2   :  { %s796_s26 = smov 0   ;;  %s798_s27 = smov 0  }
   0x3   :  { %s800_s28 = smov 0   ;;  %s802_s29 = smov 0  }
   0x4 LB: > { %s590_s30 = sadd.s32 4294967295, %s749_s29   ;;  %s591_s8 = sadd.s32 4294967294, %s749_s29   ;;  %s749_s29 = sphi %s802_s29, %s20_s29   ;;  %s745_s28 = sphi %s800_s28, %s928_s28   ;;  %s741_s27 = sphi %s798_s27, %s927_s27   ;;  %s737_s26 = sphi %s796_s26, %s926_s26   ;;  %s733_s25 = sphi %s794_s25, %s925_s25   ;;  %s729_s24 = sphi %s792_s24, %s924_s24  }
   0x5   : > { %s32_s9 = sadd.s32 1, %s745_s28  ;;  %s195_s10 = sadd.s32 1, %s737_s26 }
   0x6   : > { %p34_p0 = scmp.ge.s32.totalorder %s32_s9, 2  ;;  %p205_p1 = scmp.ne.s32.totalorder %s737_s26, %s733_s25 }
   0x7   : > { %p206_p2 = scmp.eq.s32.totalorder %s590_s30, 1  ;;  %p211_p3 = scmp.ne.s32.totalorder %s733_s25, %s729_s24 }
   0x8   : > { %s930_s9 = smov (%p34_p0, %s32_s9), 0  ;;  %p212_p5 = scmp.eq.s32.totalorder %s591_s8, 1 }
   0x9   : > { %p832_p4 = por %p206_p2, %p205_p1  ;;  %s190_s12 = ssub.s32 %s745_s28, %s930_s9 }
   0xa   : > { %p594_p6 = scmp.ge.s32.totalorder %s749_s29, 1  ;;  %p193_p7 = scmp.eq.s32.totalorder %s190_s12, 0 }
   0xb   : > { %p839_p8 = por %p212_p5, %p211_p3  ;;  %p261_p9 = scmp.lt.s32.totalorder %s749_s29, 3 }
   0xc   : > { %s845_s14 = scalar_select %p193_p7, %s737_s26, %s195_s10  }
   0xd   : > { %p262_p10 = pnand %p594_p6, %p261_p9 }
   0xe   : > { %p298_p11 = scmp.lt.s32.totalorder (!%p262_p10), %s741_s27, 1  ;;  %s294_s19 = sand.u32 (!%p262_p10), 1, %s733_s25  }
   0xf   : > { %265 = sbr.rel (%p262_p10) target bundleno = 446 (0x1be), region = 48  ;;  %s595_s20 = sshll.u32 (!%p262_p10), %s294_s19, 3 }
  0x10   : > { %s296_s8 = scalar_lea.vmem (!%p262_p10), [#allocation2], %s595_s20  ;;  %s691_s20 = scalar_lea.hbm (!%p262_p10), %s921_s7, 16 }
  0x11   : > { %s511_s10 = sshll.u32 (!%p262_p10), %s296_s8, 4  ;;  %s512_s10 = int_to_ptr.vmem [resolvable:$true] %s511_s10 }
  0x14   : > { %v311_v0 = vld [vmem:[%s916_s2] sm:$0xff]  ;;  %v751_v1 = vmov 0   ;;  %s299_s17 = scalar_select %p298_p11, %s741_s27, 1  ;;  %vm338_vm0 = vcmask 1043456   ;;  %vm334_vm1 = vcmask 31744   ;;  %vm387_vm2 = vcmask 64512  }
  0x15   : > { %669 = vset.pattern.permute.xlu0 %v751_v1  ;;  %670 = vset.pattern.permute.xlu1 %v751_v1  ;;  %v312_v3 = vld [vmem:[%s918_s4] sm:$0xff] }
  0x16   : > { %316 = vperm.xlu0 %669, %v311_v0   ;;  %s611_s18 = sshll.u32 %s299_s17, 3  ;;  %v308_v4 = vld [vmem:[%s915_s1] sm:$0xff] }
  0x17   : > { %s305_s21 = scalar_lea.vmem %s914_s0, %s611_s18  ;;  %v309_v16 = vld [vmem:[%s917_s3] sm:$0xff] }
  0x18   : > { %v329_v2 = vld [vmem:[%s305_s21] sm:$0xff]  ;;  %s612_s21 = sshll.u32 %s741_s27, 3  ;;  %s496_s27 = scalar_lea.sflag [#allocation3], %s294_s19 }
  0x19   : > { %331 = vst [vmem:[#allocation1] ss:$2 sm:$0xff] %v329_v2  ;;  %v313_v17 = vld [vmem:[%s920_s6] sm:$0xf]  ;;  %s509_s30 = scalar_lea.hbm %s921_s7, %s612_s21 }
  0x1a   : > { %326 = vperm.xlu1 %670, %v313_v17   ;;  %v310_v27 = vld [vmem:[%s919_s5] sm:$0xf]  ;;  %s513_s12 = sshll.u32 %s509_s30, 4  ;;  %s514_s12 = int_to_ptr.hbm [resolvable:$true] %s513_s12 }
  0x1b   : > { %s685_s15 = sshra.s32 %s514_s12, 4  ;;  %s686_s15 = int_to_ptr.hbm [resolvable:$true] %s685_s15 }
  0x1c   : > { %s687_s16 = scalar_lea.hbm %s686_s15, 8  ;;  %p692_p1 = scmp.lt.s32.totalorder %s686_s15, %s921_s7 }
  0x1d   : > { %p688_p12 = scmp.ne.s32.totalorder %s686_s15, %s687_s16  ;;  %p693_p2 = scmp.lt.s32.totalorder %s691_s20, %s687_s16 }
  0x1e   : > { %321 = vperm.xlu0 %669, %v312_v3  }
  0x1f   : > { %p689_p13 = pnand %p688_p12, %p832_p4  ;;  %p694_p3 = por %p693_p2, %p692_p1 }
  0x20   : > { %v332_v5 = vld.sshfl [vmem:[#allocation1] sm:$0xff pattern:$0x75316420]  ;;  %v333_v6 = vld.sshfl [vmem:[#allocation1 + $0x8] sm:$0xff pattern:$0x75316420] }
  0x21   : > { %598 = vmatpush.msk.msra.mxu0 %vm338_vm0, %v332_v5  ;;  %600 = vmatpush.msk.msra.mxu1 %vm338_vm0, %v333_v6  ;;  %482 = vst [vmem:[#allocation1] ss:$2 sm:$0xff] %v329_v2  ;;  %p690_p0 = pneg %p689_p13 }
  0x22   : > { %599 = vmatmul.msk.f32.vlgmr.msra.gmra.mxu0 %vm334_vm1, %v308_v4  ;;  %601 = vmatmul.msk.f32.vlgmr.msra.gmra.mxu1 %vm334_vm1, %v308_v4 }
  0x23   : > { %p695_p5 = pnand %p694_p3, %p690_p0 }
  0x28   : > { %v484_v35 = vld.sshfl [vmem:[#allocation1 + $0x8] sm:$0xff pattern:$0x75316420]  ;;  %v483_v38 = vld.sshfl [vmem:[#allocation1] sm:$0xff pattern:$0x75316420] }
  0x88   : > { %v317_v7 = vpop.permute.xlu0 %316 }
  0x8c   : > { %v327_v28 = vpop.permute.xlu1 %326 }
  0x90   : > { %v322_v18 = vpop.permute.xlu0 %321 }
  0x9f   : > { %v360_v8 = vpop.f32.mrf.mxu0  ;;  %v380_v9 = vpop.f32.mrf.mxu1 }
  0xa0   : > { %v361_v10 = vadd.f32 %v360_v8, %v317_v7  ;;  %v381_v11 = vadd.f32 %v380_v9, %v317_v7 }
  0xa2   : > { %v383_v12 = vmax.f32 %v361_v10, 0.0  ;;  %v384_v13 = vmax.f32 %v381_v11, 0.0 }
  0xa4   : > { %v385_v14 = vmin.f32 %v383_v12, 6.0  ;;  %v386_v15 = vmin.f32 %v384_v13, 6.0 }
  0xa6   : > { %406 = vmatpush.msra.mxu2 %v385_v14  ;;  %426 = vmatpush.msra.mxu3 %v386_v15 }
  0xa7   : > { %602 = vmatmul.msk.f32.vlgmr.msra.gmra.mxu2 %vm387_vm2, %v309_v16  ;;  %603 = vmatmul.msk.f32.vlgmr.msra.gmra.mxu3 %vm387_vm2, %v309_v16 }
 0x12a   : > { %v408_v19 = vpop.f32.mrf.mxu2  ;;  %v428_v20 = vpop.f32.mrf.mxu3 }
 0x12b   : > { %v409_v21 = vadd.f32 %v408_v19, %v322_v18  ;;  %v429_v22 = vadd.f32 %v428_v20, %v322_v18 }
 0x12d   : > { %v431_v23 = vmax.f32 %v409_v21, 0.0  ;;  %v432_v24 = vmax.f32 %v429_v22, 0.0 }
 0x12f   : > { %v433_v25 = vmin.f32 %v431_v23, 6.0  ;;  %v434_v26 = vmin.f32 %v432_v24, 6.0 }
 0x131   : > { %453 = vmatpush.msrb.mxu0 %v433_v25  ;;  %473 = vmatpush.msrb.mxu1 %v434_v26 }
 0x132   : > { %605 = vmatmul.msk.f32.vlgmr.msrb.gmra.mxu1 %vm387_vm2, %v310_v27  ;;  %604 = vmatmul.msk.f32.vlgmr.msrb.gmra.mxu0 %vm387_vm2, %v310_v27 }
 0x1af   : > { %v475_v29 = vpop.f32.mrf.mxu1  ;;  %v455_v30 = vpop.f32.mrf.mxu0 }
 0x1b0   : > { %v476_v31 = vadd.f32 %v475_v29, %v327_v28  ;;  %v456_v32 = vadd.f32 %v455_v30, %v327_v28 }
 0x1b2   : > { %v479_v33 = vmax.f32 %v476_v31, 0.0  ;;  %v478_v34 = vmax.f32 %v456_v32, 0.0 }
 0x1b4   : > { %v481_v36 = vmin.f32 %v479_v33, 6.0  ;;  %v480_v37 = vmin.f32 %v478_v34, 6.0 }
 0x1b6   : > { %v488_v39 = vadd.f32 %v484_v35, %v481_v36  ;;  %v487_v41 = vadd.f32 %v483_v38, %v480_v37 }
 0x1b8   : > { %v491_v40 = vrot.slane %v488_v39, 4 }
 0x1ba   : > { %v492_v42 = vsel %vm338_vm0, %v487_v41, %v491_v40 }
 0x1bb   : > { %494 = vst [vmem:[%s296_s8] sm:$0xff] %v492_v42 }
 0x1bc   : > { %698 = shalt.err (!%p695_p5)
}
 0x1bd   : > { %613 = dma.vmem_to_hbm [thread:$0]  (%p832_p4), %s512_s10, 128, %s514_s12, %s496_s27  }
 0x1be PF: > { %p619_p6 = scmp.ge.s32.totalorder %s749_s29, 2  ;;  %s525_s19 = sand.u32 1, %s729_s24  }
 0x1bf   : > { %s526_s23 = scalar_lea.sflag [#allocation3], %s525_s19 }
 0x1c0   : > { %p616_p7 = pnand %p619_p6, %p839_p8 }
 0x1c2   : > { %p617_p9 = pneg %p616_p7 }
 0x1c4   : > { %724 = dma.done.wait (%p617_p9), %s526_s23, 128  }
 0x1c5   : > { %726 = vsyncadd (%p617_p9), %s526_s23, 4294967168  ;;  %s20_s29 = sadd.s32 1, %s749_s29   ;;  %s924_s24 = smov %s733_s25 }
 0x1c6   : > { %p17_p10 = scmp.ge.s32.totalorder %s20_s29, 4   ;;  %s925_s25 = smov %s737_s26 }
 0x1c7   : > { %s926_s26 = smov %s845_s14  ;;  %s927_s27 = smov %s745_s28 }
 0x1c8   : > { %s928_s28 = smov %s930_s9  ;;  %19 = sbr.rel (!%p17_p10) target bundleno = 4 (0x4), region = 83 }
 0x1cd   :  { %532 = vsyncpa [#allocation3], 1 }
 0x1ce   :  { %534 = vsyncpa [#allocation3 + $0x1], 1 }

</bundles_post_ra>
